<compile_context>
chip_gen: v6e
topology: v6e:2x2x1
jax: 0.10.0
libtpu: 0.0.40
codegen_flags: <defaults>
</compile_context>

<pallas_src>
import jax
import jax.numpy as jnp
from jax.experimental import pallas as pl
from jax.experimental.pallas import tpu as pltpu

H1 = 512     # fc1 out features
H2 = 256     # fc2 out features
P_DROP = 0.5


def _policy_head_eval_kernel(x_ref, w1_ref, b1_ref, w2_ref, b2_ref, o_ref):
    # fc1: [TB, D](bf16) @ [D, 512](bf16) -> f32
    h = jnp.dot(x_ref[...], w1_ref[...], preferred_element_type=jnp.float32)
    h = jnp.maximum(h + b1_ref[...], 0.0)                       # bias + ReLU (f32)
    # fc2: [TB, 512](bf16) @ [512, 256](bf16) -> f32
    out = jnp.dot(h.astype(jnp.bfloat16), w2_ref[...],
                  preferred_element_type=jnp.float32)
    o_ref[...] = jnp.maximum(out + b2_ref[...], 0.0).astype(o_ref.dtype)


def _policy_head_train_kernel(x_ref, mask_ref, w1_ref, b1_ref, w2_ref, b2_ref,
                              o_ref):
    h = jnp.dot(x_ref[...], w1_ref[...], preferred_element_type=jnp.float32)
    h = jnp.maximum(h + b1_ref[...], 0.0)
    # mask already holds 0.0 or 1/(1-p): inverted dropout is one multiply.
    h = h * mask_ref[...]
    out = jnp.dot(h.astype(jnp.bfloat16), w2_ref[...],
                  preferred_element_type=jnp.float32)
    o_ref[...] = jnp.maximum(out + b2_ref[...], 0.0).astype(o_ref.dtype)


def policy_head(x, w1_t, b1, w2_t, b2, *, training=False, seed=0, tb=None):
    """x: [B, D] f32; w1_t: [D, 512]; b1: [512]; w2_t: [512, 256]; b2: [256]."""
    B, D = x.shape
    assert w1_t.shape == (D, H1) and w2_t.shape == (H1, H2)

    if tb is None:
        tb = min(B, 256)          # big batch tile -> full MXU rows, few grid steps
    grid = (pl.cdiv(B, tb),)

    # bf16 matmul inputs (MXU peak rate, half the weight DMA bytes); f32 biases.
    x_bf = x.astype(jnp.bfloat16)
    w1_bf = w1_t.astype(jnp.bfloat16)
    w2_bf = w2_t.astype(jnp.bfloat16)
    b1_2d = b1.reshape(1, H1).astype(jnp.float32)
    b2_2d = b2.reshape(1, H2).astype(jnp.float32)

    x_spec = pl.BlockSpec((tb, D), lambda i: (i, 0))
    w1_spec = pl.BlockSpec((D, H1), lambda i: (0, 0))
    b1_spec = pl.BlockSpec((1, H1), lambda i: (0, 0))
    w2_spec = pl.BlockSpec((H1, H2), lambda i: (0, 0))
    b2_spec = pl.BlockSpec((1, H2), lambda i: (0, 0))
    out_spec = pl.BlockSpec((tb, H2), lambda i: (i, 0))

    flops = 2 * B * D * H1 + 2 * B * H1 * H2
    bytes_accessed = (x_bf.size * 2 + w1_bf.size * 2 + w2_bf.size * 2
                      + b1_2d.size * 4 + b2_2d.size * 4 + B * H2 * 4)

    if training:
        # Dropout(p=0.5) keep-mask, pre-scaled by 1/(1-p) (inverted dropout,
        # matching torch).  Generated outside the kernel so it lowers on any
        # backend and the keep probability is exact.
        keep = jax.random.bernoulli(jax.random.PRNGKey(seed),
                                    1.0 - P_DROP, (B, H1))
        mask = keep.astype(jnp.float32) * (1.0 / (1.0 - P_DROP))
        mask_spec = pl.BlockSpec((tb, H1), lambda i: (i, 0))
        kernel = _policy_head_train_kernel
        inputs = (x_bf, mask, w1_bf, b1_2d, w2_bf, b2_2d)
        in_specs = [x_spec, mask_spec, w1_spec, b1_spec, w2_spec, b2_spec]
        bytes_accessed += mask.size * 4
    else:
        kernel = _policy_head_eval_kernel
        inputs = (x_bf, w1_bf, b1_2d, w2_bf, b2_2d)
        in_specs = [x_spec, w1_spec, b1_spec, w2_spec, b2_spec]

    return pl.pallas_call(
        kernel,
        out_shape=jax.ShapeDtypeStruct((B, H2), jnp.float32),
        grid_spec=pltpu.PrefetchScalarGridSpec(
            num_scalar_prefetch=0,
            grid=grid,
            in_specs=in_specs,
            out_specs=out_spec,
        ),
        compiler_params=pltpu.CompilerParams(
            dimension_semantics=("parallel",),          # batch axis -> 2 TCs on v7x
            vmem_limit_bytes=48 * 1024 * 1024,          # headroom within v7x 64 MiB
        ),
        cost_estimate=pl.CostEstimate(flops=flops, transcendentals=0,
                                      bytes_accessed=bytes_accessed),
    )(*inputs)


def init_params(key, input_dims):
    """Deterministic init matching nn.Linear shapes (uniform +-1/sqrt(fan_in))."""
    k1, k2, k3, k4 = jax.random.split(key, 4)
    lim1 = 1.0 / (input_dims ** 0.5)
    lim2 = 1.0 / (H1 ** 0.5)
    # Stored already transposed: [in, out], so torch's x @ W.T is x @ W_t here.
    w1_t = jax.random.uniform(k1, (input_dims, H1), jnp.float32, -lim1, lim1)
    b1 = jax.random.uniform(k2, (H1,), jnp.float32, -lim1, lim1)
    w2_t = jax.random.uniform(k3, (H1, H2), jnp.float32, -lim2, lim2)
    b2 = jax.random.uniform(k4, (H2,), jnp.float32, -lim2, lim2)
    return w1_t, b1, w2_t, b2


def reference_eval(x, w1_t, b1, w2_t, b2):
    h = jnp.maximum(x @ w1_t + b1, 0.0)
    return jnp.maximum(h @ w2_t + b2, 0.0)


def reference_train(x, w1_t, b1, w2_t, b2, mask):
    h = jnp.maximum(x @ w1_t + b1, 0.0) * mask
    return jnp.maximum(h @ w2_t + b2, 0.0)


if __name__ == "__main__":
    key = jax.random.PRNGKey(0)
    B, D = 8, 128                      # batch, input_dims (small test shapes)
    kx, kp = jax.random.split(key)
    x = jax.random.normal(kx, (B, D), jnp.float32)
    w1_t, b1, w2_t, b2 = init_params(kp, D)

    # Eval-mode forward (dropout = identity) vs pure-JAX reference.
    out = jax.block_until_ready(policy_head(x, w1_t, b1, w2_t, b2,
                                            training=False))
    ref = reference_eval(x, w1_t, b1, w2_t, b2)
    assert out.shape == (B, H2)
    assert jnp.allclose(out, ref, atol=5e-2, rtol=5e-2), "eval mismatch"

    # Training-mode forward vs reference using the identical (deterministic) mask.
    seed = 123
    out_tr = jax.block_until_ready(policy_head(x, w1_t, b1, w2_t, b2,
                                               training=True, seed=seed))
    keep = jax.random.bernoulli(jax.random.PRNGKey(seed), 1.0 - P_DROP, (B, H1))
    mask = keep.astype(jnp.float32) * (1.0 / (1.0 - P_DROP))
    ref_tr = reference_train(x, w1_t, b1, w2_t, b2, mask)
    assert out_tr.shape == (B, H2)
    assert jnp.all(out_tr >= 0.0)
    assert jnp.allclose(out_tr, ref_tr, atol=5e-2, rtol=5e-2), "train mismatch"

    print("KERNEL_OK")
</pallas_src>

<mosaic_0001>
module attributes {stable_mosaic.version = 11 : i64} {
  func.func @_policy_head_eval_kernel(%arg0: i32, %arg1: memref<8x128xbf16, #tpu.memory_space<vmem>>, %arg2: memref<128x512xbf16, #tpu.memory_space<vmem>>, %arg3: memref<1x512xf32, #tpu.memory_space<vmem>>, %arg4: memref<512x256xbf16, #tpu.memory_space<vmem>>, %arg5: memref<1x256xf32, #tpu.memory_space<vmem>>, %arg6: memref<8x256xf32, #tpu.memory_space<vmem>>) attributes {dimension_semantics = [#tpu.dimension_semantics<parallel>], iteration_bounds = array<i64: 1>, scalar_prefetch = 0 : i64, scratch_operands = 0 : i64, tpu.core_type = #tpu.core_type<tc>, window_params = [{transform_indices = @transform_0, window_bounds = array<i64: 8, 128>}, {pipeline_mode = #tpu.pipeline_mode<synchronous>, transform_indices = @transform_1, window_bounds = array<i64: 128, 512>}, {pipeline_mode = #tpu.pipeline_mode<synchronous>, transform_indices = @transform_2, window_bounds = array<i64: 1, 512>}, {pipeline_mode = #tpu.pipeline_mode<synchronous>, transform_indices = @transform_3, window_bounds = array<i64: 512, 256>}, {pipeline_mode = #tpu.pipeline_mode<synchronous>, transform_indices = @transform_4, window_bounds = array<i64: 1, 256>}, {transform_indices = @transform_5, window_bounds = array<i64: 8, 256>}]} {
    %c0 = arith.constant 0 : index
    %c0_0 = arith.constant 0 : index
    %0 = vector.load %arg1[%c0, %c0_0] : memref<8x128xbf16, #tpu.memory_space<vmem>>, vector<8x128xbf16>
    %c0_1 = arith.constant 0 : index
    %c0_2 = arith.constant 0 : index
    %1 = vector.load %arg2[%c0_1, %c0_2] : memref<128x512xbf16, #tpu.memory_space<vmem>>, vector<128x512xbf16>
    %cst = arith.constant dense<0.000000e+00> : vector<8x512xf32>
    %2 = tpu.matmul %0, %1, %cst {dimension_numbers = #tpu.dot_dimension_numbers<[1], [0], [0], [1], [0, 0, 1, 1], [], []>} : vector<8x128xbf16>, vector<128x512xbf16>, vector<8x512xf32> -> vector<8x512xf32>
    %c0_3 = arith.constant 0 : index
    %c0_4 = arith.constant 0 : index
    %3 = vector.load %arg3[%c0_3, %c0_4] : memref<1x512xf32, #tpu.memory_space<vmem>>, vector<1x512xf32>
    %4 = vector.broadcast %3 : vector<1x512xf32> to vector<8x512xf32>
    %5 = arith.addf %2, %4 : vector<8x512xf32>
    %cst_5 = arith.constant 0.000000e+00 : f32
    %6 = vector.broadcast %cst_5 : f32 to vector<8x512xf32>
    %7 = arith.maximumf %5, %6 : vector<8x512xf32>
    %8 = arith.truncf %7 : vector<8x512xf32> to vector<8x512xbf16>
    %c0_6 = arith.constant 0 : index
    %c0_7 = arith.constant 0 : index
    %9 = vector.load %arg4[%c0_6, %c0_7] : memref<512x256xbf16, #tpu.memory_space<vmem>>, vector<512x256xbf16>
    %cst_8 = arith.constant dense<0.000000e+00> : vector<8x256xf32>
    %10 = tpu.matmul %8, %9, %cst_8 {dimension_numbers = #tpu.dot_dimension_numbers<[1], [0], [0], [1], [0, 0, 1, 1], [], []>} : vector<8x512xbf16>, vector<512x256xbf16>, vector<8x256xf32> -> vector<8x256xf32>
    %c0_9 = arith.constant 0 : index
    %c0_10 = arith.constant 0 : index
    %11 = vector.load %arg5[%c0_9, %c0_10] : memref<1x256xf32, #tpu.memory_space<vmem>>, vector<1x256xf32>
    %12 = vector.broadcast %11 : vector<1x256xf32> to vector<8x256xf32>
    %13 = arith.addf %10, %12 : vector<8x256xf32>
    %cst_11 = arith.constant 0.000000e+00 : f32
    %14 = vector.broadcast %cst_11 : f32 to vector<8x256xf32>
    %15 = arith.maximumf %13, %14 : vector<8x256xf32>
    %c0_12 = arith.constant 0 : index
    %c0_13 = arith.constant 0 : index
    %16 = vector.load %arg6[%c0_12, %c0_13] : memref<8x256xf32, #tpu.memory_space<vmem>>, vector<8x256xf32>
    tpu.vector_store %arg6[%c0_12, %c0_13], %15 {strides = array<i32>} : memref<8x256xf32, #tpu.memory_space<vmem>>, vector<8x256xf32>,
    return
  }
  func.func @transform_0(%arg0: i32) -> (i32, i32) {
    %c0_i32 = arith.constant 0 : i32
    %c0_i32_0 = arith.constant 0 : i32
    return %arg0, %c0_i32 : i32, i32
  }
  func.func @transform_1(%arg0: i32) -> (i32, i32) {
    %c0_i32 = arith.constant 0 : i32
    %c0_i32_0 = arith.constant 0 : i32
    %c0_i32_1 = arith.constant 0 : i32
    return %c0_i32, %c0_i32_0 : i32, i32
  }
  func.func @transform_2(%arg0: i32) -> (i32, i32) {
    %c0_i32 = arith.constant 0 : i32
    %c0_i32_0 = arith.constant 0 : i32
    %c0_i32_1 = arith.constant 0 : i32
    return %c0_i32, %c0_i32_0 : i32, i32
  }
  func.func @transform_3(%arg0: i32) -> (i32, i32) {
    %c0_i32 = arith.constant 0 : i32
    %c0_i32_0 = arith.constant 0 : i32
    %c0_i32_1 = arith.constant 0 : i32
    return %c0_i32, %c0_i32_0 : i32, i32
  }
  func.func @transform_4(%arg0: i32) -> (i32, i32) {
    %c0_i32 = arith.constant 0 : i32
    %c0_i32_0 = arith.constant 0 : i32
    %c0_i32_1 = arith.constant 0 : i32
    return %c0_i32, %c0_i32_0 : i32, i32
  }
  func.func @transform_5(%arg0: i32) -> (i32, i32) {
    %c0_i32 = arith.constant 0 : i32
    %c0_i32_0 = arith.constant 0 : i32
    return %arg0, %c0_i32 : i32, i32
  }
}

</mosaic_0001>

<bundles_post_ra>
// kernel: tpu_custom_call.1
= control target key start
LH: loop header
LB: loop body
LE: loop exit
PB: predicated region body
PF: predicated region fallthrough
CT: control target
= control target key end

     0   :  { %10 = vsyncpa [#allocation3], 0  ;;  %s1293_s0 = inlined_call_operand.hbm [shape: bf16[8,128], index: 0, kind: input, shape index: {}]   ;;  %s1294_s1 = inlined_call_operand.hbm [shape: bf16[128,512], index: 1, kind: input, shape index: {}]   ;;  %s1295_s2 = inlined_call_operand.hbm [shape: f32[1,512], index: 2, kind: input, shape index: {}]   ;;  %s1296_s3 = inlined_call_operand.hbm [shape: bf16[512,256], index: 3, kind: input, shape index: {}]   ;;  %s1297_s4 = inlined_call_operand.vmem [shape: f32[1,256], index: 4, kind: input, shape index: {}]   ;;  %s1298_s5 = inlined_call_operand.hbm [shape: f32[8,256], index: 5, kind: output, shape index: {}]  }
   0x1   :  { %11 = vsyncpa [#allocation6], 0 }
   0x2   :  { %12 = vsyncpa [#allocation9], 0 }
   0x3   :  { %13 = vsyncpa [#allocation4], 0  ;;  %s1235_s18 = smov [#allocation5]  }
   0x4   :  { %s29_s19 = sshll.u32 %s1235_s18, 4  ;;  %s30_s19 = int_to_ptr.vmem [resolvable:$true] %s29_s19 }
   0x5   :  { %s1135_s20 = scalar_lea.vmem %s30_s19, 4096  ;;  %p1140_p1 = scmp.lt.s32.totalorder %s30_s19, %s30_s19 }
   0x6   :  { %p1136_p0 = scmp.ne.s32.totalorder %s30_s19, %s1135_s20  ;;  %p1141_p2 = scmp.lt.s32.totalorder %s1135_s20, %s1135_s20 }
   0x8   :  { %p1142_p3 = por %p1141_p2, %p1140_p1 }
   0xa   :  { %p1143_p4 = pnand %p1142_p3, %p1136_p0 }
   0xc   :  { %1146 = shalt.err (!%p1143_p4)
}
   0xd   :  { %s1236_s21 = smov 256   ;;  %s1237_s22 = smov 16  }
   0xe   :  { %35 = dma.hbm_to_vmem [thread:$0]  %s1294_s1, 4096, %s30_s19, [#allocation6], %s1236_s21, %s1236_s21, %s1237_s22  }
   0xf   :  { %s1238_s25 = smov [#allocation2]   ;;  %s1239_s27 = smov [#allocation7]  }
  0x10   :  { %s20_s26 = sshll.u32 %s1238_s25, 4  ;;  %s42_s28 = sshll.u32 %s1239_s27, 4  ;;  %s21_s26 = int_to_ptr.vmem [resolvable:$true] %s20_s26  ;;  %s43_s28 = int_to_ptr.vmem [resolvable:$true] %s42_s28 }
  0x11   :  { %s1155_s29 = scalar_lea.vmem %s21_s26, 64  ;;  %p1160_p6 = scmp.lt.s32.totalorder %s21_s26, %s21_s26 }
  0x12   :  { %p1156_p5 = scmp.ne.s32.totalorder %s21_s26, %s1155_s29  ;;  %p1161_p7 = scmp.lt.s32.totalorder %s1155_s29, %s1155_s29 }
  0x14   :  { %p1162_p8 = por %p1161_p7, %p1160_p6 }
  0x16   :  { %p1163_p9 = pnand %p1162_p8, %p1156_p5 }
  0x18   :  { %1166 = shalt.err (!%p1163_p9)
}
  0x19   :  { %23 = dma.hbm_to_vmem [thread:$0]  %s1293_s0, 64, %s21_s26, [#allocation3]  }
  0x1a   :  { %s1175_s7 = scalar_lea.vmem %s43_s28, 64  ;;  %p1180_p11 = scmp.lt.s32.totalorder %s43_s28, %s43_s28 }
  0x1b   :  { %p1176_p10 = scmp.ne.s32.totalorder %s43_s28, %s1175_s7  ;;  %p1181_p12 = scmp.lt.s32.totalorder %s1175_s7, %s1175_s7 }
  0x1d   :  { %p1182_p13 = por %p1181_p12, %p1180_p11 }
  0x1f   :  { %p1183_p0 = pnand %p1182_p13, %p1176_p10 }
  0x21   :  { %1186 = shalt.err (!%p1183_p0)
}
  0x22   :  { %45 = dma.hbm_to_vmem [thread:$0]  %s1295_s2, 64, %s43_s28, [#allocation6]  }
  0x23   :  { %s1240_s9 = smov [#allocation8]  }
  0x24   :  { %s51_s10 = sshll.u32 %s1240_s9, 4  ;;  %s52_s10 = int_to_ptr.vmem [resolvable:$true] %s51_s10 }
  0x25   :  { %s1195_s11 = scalar_lea.vmem %s52_s10, 8192  ;;  %p1200_p2 = scmp.lt.s32.totalorder %s52_s10, %s52_s10 }
  0x26   :  { %p1196_p1 = scmp.ne.s32.totalorder %s52_s10, %s1195_s11  ;;  %p1201_p3 = scmp.lt.s32.totalorder %s1195_s11, %s1195_s11 }
  0x28   :  { %p1202_p4 = por %p1201_p3, %p1200_p2 }
  0x2a   :  { %p1203_p5 = pnand %p1202_p4, %p1196_p1 }
  0x2c   :  { %1206 = shalt.err (!%p1203_p5)
}
  0x2d   :  { %s1241_s0 = smov 128   ;;  %s1242_s12 = smov 8  }
  0x2e   :  { %57 = dma.hbm_to_vmem [thread:$0]  %s1296_s3, 8192, %s52_s10, [#allocation9], %s1241_s0, %s1241_s0, %s1242_s12  }
  0x2f   :  { %1227 = dma.done.wait [#allocation3], 64  }
  0x30   :  { %1228 = vsyncadd [#allocation3], 4294967232 }
  0x31   :  { %1229 = dma.done.wait [#allocation6], 4160  }
  0x32   :  { %1230 = vsyncadd [#allocation6], 4294963136 }
  0x33   :  { %1231 = dma.done.wait [#allocation9], 8192  }
  0x34   :  { %1232 = vsyncadd [#allocation9], 4294959104  ;;  %v1243_v0 = vmov 0   ;;  %v983_v1 = vld [vmem:[#allocation5 + $0xe4] ss:$16 sps:$4 sm:$0xff]   ;;  %s1244_s15 = smov [#allocation10]  }
  0x35   :  { %320 = vmatprep.mubr.bf16.mxu0 %v1243_v0  ;;  %361 = vmatprep.mubr.bf16.mxu1 %v1243_v0  ;;  %v985_v2 = vld [vmem:[#allocation5 + $0xec] ss:$16 sps:$4 sm:$0xff]   ;;  %v987_v3 = vld [vmem:[#allocation5 + $0xe0] ss:$16 sps:$4 sm:$0xff]   ;;  %v988_v4 = vld [vmem:[#allocation5 + $0xe8] ss:$16 sps:$4 sm:$0xff]  }
  0x36   :  { %288 = vmatprep.subr.bf16.mxu0 %v983_v1  ;;  %329 = vmatprep.subr.bf16.mxu1 %v985_v2  ;;  %v989_v5 = vld [vmem:[#allocation5 + $0xc4] ss:$16 sps:$4 sm:$0xff]   ;;  %v991_v6 = vld [vmem:[#allocation5 + $0xcc] ss:$16 sps:$4 sm:$0xff]   ;;  %v993_v7 = vld [vmem:[#allocation5 + $0xc0] ss:$16 sps:$4 sm:$0xff]  }
  0x37   :  { %289 = vmatpush1.bf16.msra.mxu0 %v987_v3  ;;  %330 = vmatpush1.bf16.msra.mxu1 %v988_v4  ;;  %v994_v8 = vld [vmem:[#allocation5 + $0xc8] ss:$16 sps:$4 sm:$0xff]   ;;  %v995_v9 = vld [vmem:[#allocation5 + $0xa4] ss:$16 sps:$4 sm:$0xff]   ;;  %v997_v10 = vld [vmem:[#allocation5 + $0xac] ss:$16 sps:$4 sm:$0xff]  }
  0x38   :  { %290 = vmatprep.subr.bf16.mxu0 %v989_v5  ;;  %331 = vmatprep.subr.bf16.mxu1 %v991_v6  ;;  %v999_v11 = vld [vmem:[#allocation5 + $0xa0] ss:$16 sps:$4 sm:$0xff]   ;;  %v1000_v12 = vld [vmem:[#allocation5 + $0xa8] ss:$16 sps:$4 sm:$0xff]   ;;  %v1001_v13 = vld [vmem:[#allocation5 + $0x84] ss:$16 sps:$4 sm:$0xff]  }
  0x39   :  { %v1003_v14 = vld [vmem:[#allocation5 + $0x8c] ss:$16 sps:$4 sm:$0xff]   ;;  %v1005_v15 = vld [vmem:[#allocation5 + $0x80] ss:$16 sps:$4 sm:$0xff]   ;;  %v1006_v16 = vld [vmem:[#allocation5 + $0x88] ss:$16 sps:$4 sm:$0xff]  }
  0x3a   :  { %v1007_v17 = vld [vmem:[#allocation5 + $0x64] ss:$16 sps:$4 sm:$0xff]   ;;  %v1009_v18 = vld [vmem:[#allocation5 + $0x6c] ss:$16 sps:$4 sm:$0xff]   ;;  %v1011_v19 = vld [vmem:[#allocation5 + $0x60] ss:$16 sps:$4 sm:$0xff]  }
  0x3b   :  { %291 = vmatpush1.bf16.msra.mxu0 %v993_v7  ;;  %332 = vmatpush1.bf16.msra.mxu1 %v994_v8  ;;  %v1012_v20 = vld [vmem:[#allocation5 + $0x68] ss:$16 sps:$4 sm:$0xff]   ;;  %v1013_v21 = vld [vmem:[#allocation5 + $0x44] ss:$16 sps:$4 sm:$0xff]   ;;  %v1015_v22 = vld [vmem:[#allocation5 + $0x4c] ss:$16 sps:$4 sm:$0xff]  }
  0x3c   :  { %292 = vmatprep.subr.bf16.mxu0 %v995_v9  ;;  %333 = vmatprep.subr.bf16.mxu1 %v997_v10  ;;  %v1017_v23 = vld [vmem:[#allocation5 + $0x40] ss:$16 sps:$4 sm:$0xff]   ;;  %v1018_v24 = vld [vmem:[#allocation5 + $0x48] ss:$16 sps:$4 sm:$0xff]   ;;  %v1019_v25 = vld [vmem:[#allocation5 + $0x24] ss:$16 sps:$4 sm:$0xff]  }
  0x3d   :  { %v1021_v26 = vld [vmem:[#allocation5 + $0x2c] ss:$16 sps:$4 sm:$0xff]   ;;  %v1023_v27 = vld [vmem:[#allocation5 + $0x20] ss:$16 sps:$4 sm:$0xff]   ;;  %v1024_v28 = vld [vmem:[#allocation5 + $0x28] ss:$16 sps:$4 sm:$0xff]  }
  0x3e   :  { %v1025_v29 = vld [vmem:[#allocation5 + $0x4] ss:$16 sps:$4 sm:$0xff]   ;;  %v1027_v30 = vld [vmem:[#allocation5 + $0xc] ss:$16 sps:$4 sm:$0xff]   ;;  %v1029_v31 = vld [vmem:[#allocation5] ss:$16 sps:$4 sm:$0xff]  }
  0x3f   :  { %293 = vmatpush1.bf16.msra.mxu0 %v999_v11  ;;  %334 = vmatpush1.bf16.msra.mxu1 %v1000_v12  ;;  %v1030_v32 = vld [vmem:[#allocation5 + $0x8] ss:$16 sps:$4 sm:$0xff]   ;;  %v73_v35 = vld [vmem:[#allocation2] sm:$0xf]  ;;  %v1037_v40 = vld [vmem:[#allocation8 + $0x60] ss:$8 sps:$4 sm:$0xff]  }
  0x40   :  { %294 = vmatprep.subr.bf16.mxu0 %v1001_v13  ;;  %335 = vmatprep.subr.bf16.mxu1 %v1003_v14  ;;  %v1033_v33 = vld [vmem:[#allocation8 + $0x74] ss:$8 sps:$4 sm:$0xff]   ;;  %v1031_v36 = vld [vmem:[#allocation8 + $0x70] ss:$8 sps:$4 sm:$0xff]   ;;  %v1039_v38 = vld [vmem:[#allocation8 + $0x64] ss:$8 sps:$4 sm:$0xff]  }
  0x41   :  { %v1036_v34 = vld [vmem:[#allocation8 + $0x174] ss:$8 sps:$4 sm:$0xff]   ;;  %v1034_v37 = vld [vmem:[#allocation8 + $0x170] ss:$8 sps:$4 sm:$0xff]   ;;  %v1042_v39 = vld [vmem:[#allocation8 + $0x164] ss:$8 sps:$4 sm:$0xff]  }
  0x42   :  { %v1040_v41 = vld [vmem:[#allocation8 + $0x160] ss:$8 sps:$4 sm:$0xff]   ;;  %v1045_v42 = vld [vmem:[#allocation8 + $0x54] ss:$8 sps:$4 sm:$0xff]   ;;  %v1043_v44 = vld [vmem:[#allocation8 + $0x50] ss:$8 sps:$4 sm:$0xff]  }
  0x43   :  { %295 = vmatpush1.bf16.msra.mxu0 %v1005_v15  ;;  %336 = vmatpush1.bf16.msra.mxu1 %v1006_v16  ;;  %v1048_v43 = vld [vmem:[#allocation8 + $0x154] ss:$8 sps:$4 sm:$0xff]   ;;  %v1046_v45 = vld [vmem:[#allocation8 + $0x150] ss:$8 sps:$4 sm:$0xff]   ;;  %v1051_v46 = vld [vmem:[#allocation8 + $0x44] ss:$8 sps:$4 sm:$0xff]  }
  0x44   :  { %296 = vmatprep.subr.bf16.mxu0 %v1007_v17  ;;  %337 = vmatprep.subr.bf16.mxu1 %v1009_v18  ;;  %v1054_v47 = vld [vmem:[#allocation8 + $0x144] ss:$8 sps:$4 sm:$0xff]   ;;  %v1049_v48 = vld [vmem:[#allocation8 + $0x40] ss:$8 sps:$4 sm:$0xff]   ;;  %v1057_v50 = vld [vmem:[#allocation8 + $0x34] ss:$8 sps:$4 sm:$0xff]  }
  0x45   :  { %v1052_v49 = vld [vmem:[#allocation8 + $0x140] ss:$8 sps:$4 sm:$0xff]   ;;  %v1060_v51 = vld [vmem:[#allocation8 + $0x134] ss:$8 sps:$4 sm:$0xff]   ;;  %v1055_v52 = vld [vmem:[#allocation8 + $0x30] ss:$8 sps:$4 sm:$0xff]  }
  0x46   :  { %v1058_v53 = vld [vmem:[#allocation8 + $0x130] ss:$8 sps:$4 sm:$0xff]   ;;  %v1063_v54 = vld [vmem:[#allocation8 + $0x24] ss:$8 sps:$4 sm:$0xff]   ;;  %v1061_v56 = vld [vmem:[#allocation8 + $0x20] ss:$8 sps:$4 sm:$0xff]  }
  0x47   :  { %297 = vmatpush1.bf16.msra.mxu0 %v1011_v19  ;;  %338 = vmatpush1.bf16.msra.mxu1 %v1012_v20  ;;  %v1066_v55 = vld [vmem:[#allocation8 + $0x124] ss:$8 sps:$4 sm:$0xff]   ;;  %v1064_v57 = vld [vmem:[#allocation8 + $0x120] ss:$8 sps:$4 sm:$0xff]   ;;  %v1069_v58 = vld [vmem:[#allocation8 + $0x14] ss:$8 sps:$4 sm:$0xff]  }
  0x48   :  { %298 = vmatprep.subr.bf16.mxu0 %v1013_v21  ;;  %339 = vmatprep.subr.bf16.mxu1 %v1015_v22  ;;  %v1072_v59 = vld [vmem:[#allocation8 + $0x114] ss:$8 sps:$4 sm:$0xff]   ;;  %v1067_v60 = vld [vmem:[#allocation8 + $0x10] ss:$8 sps:$4 sm:$0xff]   ;;  %v1075_v62 = vld [vmem:[#allocation8 + $0x4] ss:$8 sps:$4 sm:$0xff]  }
  0x49   :  { %v1070_v61 = vld [vmem:[#allocation8 + $0x110] ss:$8 sps:$4 sm:$0xff]   ;;  %v1078_v63 = vld [vmem:[#allocation8 + $0x104] ss:$8 sps:$4 sm:$0xff]   ;;  %v1073_v0 = vld [vmem:[#allocation8] ss:$8 sps:$4 sm:$0xff]  }
  0x4a   :  { %v1076_v1 = vld [vmem:[#allocation8 + $0x100] ss:$8 sps:$4 sm:$0xff]   ;;  %v1081_v2 = vld [vmem:[#allocation8 + $0xf4] ss:$8 sps:$4 sm:$0xff]   ;;  %v1079_v4 = vld [vmem:[#allocation8 + $0xf0] ss:$8 sps:$4 sm:$0xff]  }
  0x4b   :  { %299 = vmatpush1.bf16.msra.mxu0 %v1017_v23  ;;  %340 = vmatpush1.bf16.msra.mxu1 %v1018_v24  ;;  %v1084_v3 = vld [vmem:[#allocation8 + $0x1f4] ss:$8 sps:$4 sm:$0xff]   ;;  %v1082_v5 = vld [vmem:[#allocation8 + $0x1f0] ss:$8 sps:$4 sm:$0xff]   ;;  %v1087_v6 = vld [vmem:[#allocation8 + $0xe4] ss:$8 sps:$4 sm:$0xff]  }
  0x4c   :  { %300 = vmatprep.subr.bf16.mxu0 %v1019_v25  ;;  %341 = vmatprep.subr.bf16.mxu1 %v1021_v26  ;;  %v1090_v7 = vld [vmem:[#allocation8 + $0x1e4] ss:$8 sps:$4 sm:$0xff]   ;;  %v1085_v8 = vld [vmem:[#allocation8 + $0xe0] ss:$8 sps:$4 sm:$0xff]   ;;  %v1093_v10 = vld [vmem:[#allocation8 + $0xd4] ss:$8 sps:$4 sm:$0xff]  }
  0x4d   :  { %v1088_v9 = vld [vmem:[#allocation8 + $0x1e0] ss:$8 sps:$4 sm:$0xff]   ;;  %v1096_v11 = vld [vmem:[#allocation8 + $0x1d4] ss:$8 sps:$4 sm:$0xff]   ;;  %v1091_v12 = vld [vmem:[#allocation8 + $0xd0] ss:$8 sps:$4 sm:$0xff]  }
  0x4e   :  { %v1094_v13 = vld [vmem:[#allocation8 + $0x1d0] ss:$8 sps:$4 sm:$0xff]   ;;  %v1099_v14 = vld [vmem:[#allocation8 + $0xc4] ss:$8 sps:$4 sm:$0xff]   ;;  %v1097_v16 = vld [vmem:[#allocation8 + $0xc0] ss:$8 sps:$4 sm:$0xff]  }
  0x4f   :  { %301 = vmatpush1.bf16.msra.mxu0 %v1023_v27  ;;  %342 = vmatpush1.bf16.msra.mxu1 %v1024_v28  ;;  %v1102_v15 = vld [vmem:[#allocation8 + $0x1c4] ss:$8 sps:$4 sm:$0xff]   ;;  %v1100_v17 = vld [vmem:[#allocation8 + $0x1c0] ss:$8 sps:$4 sm:$0xff]   ;;  %v1105_v18 = vld [vmem:[#allocation8 + $0xb4] ss:$8 sps:$4 sm:$0xff]  }
  0x50   :  { %302 = vmatprep.subr.bf16.mxu0 %v1025_v29  ;;  %343 = vmatprep.subr.bf16.mxu1 %v1027_v30  ;;  %v1108_v19 = vld [vmem:[#allocation8 + $0x1b4] ss:$8 sps:$4 sm:$0xff]   ;;  %v1103_v20 = vld [vmem:[#allocation8 + $0xb0] ss:$8 sps:$4 sm:$0xff]   ;;  %v1111_v22 = vld [vmem:[#allocation8 + $0xa4] ss:$8 sps:$4 sm:$0xff]  }
  0x51   :  { %v1106_v21 = vld [vmem:[#allocation8 + $0x1b0] ss:$8 sps:$4 sm:$0xff]   ;;  %v1114_v23 = vld [vmem:[#allocation8 + $0x1a4] ss:$8 sps:$4 sm:$0xff]   ;;  %v1109_v24 = vld [vmem:[#allocation8 + $0xa0] ss:$8 sps:$4 sm:$0xff]  }
  0x52   :  { %v1112_v25 = vld [vmem:[#allocation8 + $0x1a0] ss:$8 sps:$4 sm:$0xff]   ;;  %v1117_v26 = vld [vmem:[#allocation8 + $0x94] ss:$8 sps:$4 sm:$0xff]   ;;  %v1115_v28 = vld [vmem:[#allocation8 + $0x90] ss:$8 sps:$4 sm:$0xff]  }
  0x53   :  { %303 = vmatpush1.bf16.msra.mxu0 %v1029_v31  ;;  %344 = vmatpush1.bf16.msra.mxu1 %v1030_v32  ;;  %v1120_v27 = vld [vmem:[#allocation8 + $0x194] ss:$8 sps:$4 sm:$0xff]   ;;  %v1118_v29 = vld [vmem:[#allocation8 + $0x190] ss:$8 sps:$4 sm:$0xff]   ;;  %v1123_v30 = vld [vmem:[#allocation8 + $0x84] ss:$8 sps:$4 sm:$0xff]  }
  0x54   :  { %774 = vmatprep.subr.bf16.mxu0 %v1033_v33  ;;  %815 = vmatprep.subr.bf16.mxu1 %v1036_v34  ;;  %v1126_v31 = vld [vmem:[#allocation8 + $0x184] ss:$8 sps:$4 sm:$0xff]   ;;  %v1121_v32 = vld [vmem:[#allocation8 + $0x80] ss:$8 sps:$4 sm:$0xff]   ;;  %v108_v34 = vlaneseq  ;;  %s866_s16 = sshll.u32 %s1244_s15, 4  ;;  %s867_s16 = int_to_ptr.vmem [resolvable:$true] %s866_s16 }
  0x55   :  { %v1124_v33 = vld [vmem:[#allocation8 + $0x180] ss:$8 sps:$4 sm:$0xff]   ;;  %p1212_p7 = scmp.lt.s32.totalorder %s867_s16, %s867_s16 }
  0x56   :  { %321 = vmatmul.mubr.bf16.vlgmr.msra.gmra.mxu0 %v73_v35  ;;  %362 = vmatmul.mubr.bf16.vlgmr.msra.gmra.mxu1 %v73_v35  ;;  %v109_v35 = vshrl.u32 %v108_v34, 7 }
  0x57   :  { %775 = vmatpush1.bf16.msra.mxu0 %v1031_v36  ;;  %816 = vmatpush1.bf16.msra.mxu1 %v1034_v37 }
  0x58   :  { %776 = vmatprep.subr.bf16.mxu0 %v1039_v38  ;;  %817 = vmatprep.subr.bf16.mxu1 %v1042_v39  ;;  %v110_v36 = vsub.s32 0, %v109_v35  ;;  %v118_v37 = vsub.s32 2, %v109_v35  ;;  %v106_v38 = vld [vmem:[#allocation7] sm:$0xf]  ;;  %v114_v39 = vsub.s32 1, %v109_v35 }
  0x5b   :  { %777 = vmatpush1.bf16.msra.mxu0 %v1037_v40  ;;  %818 = vmatpush1.bf16.msra.mxu1 %v1040_v41  ;;  %v122_v40 = vsub.s32 3, %v109_v35  ;;  %v111_v41 = vrot.slane %v106_v38, %v110_v36 }
  0x5c   :  { %778 = vmatprep.subr.bf16.mxu0 %v1045_v42  ;;  %819 = vmatprep.subr.bf16.mxu1 %v1048_v43  ;;  %v119_v42 = vrot.slane %v106_v38, %v118_v37  ;;  %v115_v43 = vrot.slane %v106_v38, %v114_v39 }
  0x5f   :  { %779 = vmatpush1.bf16.msra.mxu0 %v1043_v44  ;;  %820 = vmatpush1.bf16.msra.mxu1 %v1046_v45  ;;  %v123_v44 = vrot.slane %v106_v38, %v122_v40 }
  0x60   :  { %780 = vmatprep.subr.bf16.mxu0 %v1051_v46  ;;  %821 = vmatprep.subr.bf16.mxu1 %v1054_v47 }
  0x63   :  { %781 = vmatpush1.bf16.msra.mxu0 %v1049_v48  ;;  %822 = vmatpush1.bf16.msra.mxu1 %v1052_v49 }
  0x64   :  { %782 = vmatprep.subr.bf16.mxu0 %v1057_v50  ;;  %823 = vmatprep.subr.bf16.mxu1 %v1060_v51 }
  0x67   :  { %783 = vmatpush1.bf16.msra.mxu0 %v1055_v52  ;;  %824 = vmatpush1.bf16.msra.mxu1 %v1058_v53 }
  0x68   :  { %784 = vmatprep.subr.bf16.mxu0 %v1063_v54  ;;  %825 = vmatprep.subr.bf16.mxu1 %v1066_v55 }
  0x6b   :  { %785 = vmatpush1.bf16.msra.mxu0 %v1061_v56  ;;  %826 = vmatpush1.bf16.msra.mxu1 %v1064_v57 }
  0x6c   :  { %786 = vmatprep.subr.bf16.mxu0 %v1069_v58  ;;  %827 = vmatprep.subr.bf16.mxu1 %v1072_v59 }
  0x6f   :  { %787 = vmatpush1.bf16.msra.mxu0 %v1067_v60  ;;  %828 = vmatpush1.bf16.msra.mxu1 %v1070_v61 }
  0x70   :  { %788 = vmatprep.subr.bf16.mxu0 %v1075_v62  ;;  %829 = vmatprep.subr.bf16.mxu1 %v1078_v63 }
  0x73   :  { %789 = vmatpush1.bf16.msra.mxu0 %v1073_v0  ;;  %830 = vmatpush1.bf16.msra.mxu1 %v1076_v1  ;;  %v442_v1 = vld [vmem:[%s1297_s4] sm:$0x3]  ;;  %s1207_s4 = scalar_lea.vmem %s867_s16, 256 }
  0x74   :  { %790 = vmatprep.subr.bf16.mxu0 %v1081_v2  ;;  %831 = vmatprep.subr.bf16.mxu1 %v1084_v3  ;;  %v447_v2 = vrot.slane %v442_v1, %v110_v36  ;;  %v451_v3 = vrot.slane %v442_v1, %v114_v39  ;;  %p1208_p6 = scmp.ne.s32.totalorder %s867_s16, %s1207_s4  ;;  %p1213_p8 = scmp.lt.s32.totalorder %s1207_s4, %s1207_s4 }
  0x76   :  { %p1214_p9 = por %p1213_p8, %p1212_p7 }
  0x77   :  { %791 = vmatpush2.bf16.msra.mxu0 %v1079_v4  ;;  %832 = vmatpush2.bf16.msra.mxu1 %v1082_v5 }
  0x78   :  { %792 = vmatprep.subr.bf16.mxu0 %v1087_v6  ;;  %833 = vmatprep.subr.bf16.mxu1 %v1090_v7  ;;  %p1215_p10 = pnand %p1214_p9, %p1208_p6 }
  0x7b   :  { %793 = vmatpush2.bf16.msra.mxu0 %v1085_v8  ;;  %834 = vmatpush2.bf16.msra.mxu1 %v1088_v9 }
  0x7c   :  { %794 = vmatprep.subr.bf16.mxu0 %v1093_v10  ;;  %835 = vmatprep.subr.bf16.mxu1 %v1096_v11 }
  0x7f   :  { %795 = vmatpush2.bf16.msra.mxu0 %v1091_v12  ;;  %836 = vmatpush2.bf16.msra.mxu1 %v1094_v13 }
  0x80   :  { %796 = vmatprep.subr.bf16.mxu0 %v1099_v14  ;;  %837 = vmatprep.subr.bf16.mxu1 %v1102_v15 }
  0x83   :  { %797 = vmatpush2.bf16.msra.mxu0 %v1097_v16  ;;  %838 = vmatpush2.bf16.msra.mxu1 %v1100_v17 }
  0x84   :  { %798 = vmatprep.subr.bf16.mxu0 %v1105_v18  ;;  %839 = vmatprep.subr.bf16.mxu1 %v1108_v19 }
  0x87   :  { %799 = vmatpush2.bf16.msra.mxu0 %v1103_v20  ;;  %840 = vmatpush2.bf16.msra.mxu1 %v1106_v21 }
  0x88   :  { %800 = vmatprep.subr.bf16.mxu0 %v1111_v22  ;;  %841 = vmatprep.subr.bf16.mxu1 %v1114_v23 }
  0x8b   :  { %801 = vmatpush2.bf16.msra.mxu0 %v1109_v24  ;;  %842 = vmatpush2.bf16.msra.mxu1 %v1112_v25 }
  0x8c   :  { %802 = vmatprep.subr.bf16.mxu0 %v1117_v26  ;;  %843 = vmatprep.subr.bf16.mxu1 %v1120_v27 }
  0x8f   :  { %803 = vmatpush2.bf16.msra.mxu0 %v1115_v28  ;;  %844 = vmatpush2.bf16.msra.mxu1 %v1118_v29 }
  0x90   :  { %804 = vmatprep.subr.bf16.mxu0 %v1123_v30  ;;  %845 = vmatprep.subr.bf16.mxu1 %v1126_v31 }
  0x93   :  { %805 = vmatpush2.bf16.msra.mxu0 %v1121_v32  ;;  %846 = vmatpush2.bf16.msra.mxu1 %v1124_v33 }
 0x116   :  { %v322_v45 = vpop.f32.mrf.mxu0  ;;  %v363_v46 = vpop.f32.mrf.mxu1 }
 0x117   :  { %v323_v47 = vadd.f32 %v322_v45, %v111_v41  ;;  %v364_v48 = vadd.f32 %v363_v46, %v119_v42 }
 0x118   :  { %v324_v49 = vpop.f32.mrf.mxu0  ;;  %v365_v50 = vpop.f32.mrf.mxu1 }
 0x119   :  { %v372_v51 = vmax.f32 %v364_v48, 0.0  ;;  %v325_v52 = vadd.f32 %v324_v49, %v115_v43  ;;  %v366_v53 = vadd.f32 %v365_v50, %v123_v44  ;;  %v370_v54 = vmax.f32 %v323_v47, 0.0 }
 0x11a   :  { %v326_v55 = vpop.f32.mrf.mxu0  ;;  %v367_v56 = vpop.f32.mrf.mxu1 }
 0x11b   :  { %v371_v57 = vmax.f32 %v325_v52, 0.0  ;;  %v373_v58 = vmax.f32 %v366_v53, 0.0  ;;  %v376_v59 = vpack.c.bf16 %v372_v51, %v372_v51  ;;  %v374_v0 = vpack.c.bf16 %v370_v54, %v370_v54 }
 0x11c   :  { %v327_v60 = vpop.f32.mrf.mxu0  ;;  %v368_v61 = vpop.f32.mrf.mxu1 }
 0x11d   :  { %v375_v62 = vpack.c.bf16 %v371_v57, %v371_v57  ;;  %v377_v63 = vpack.c.bf16 %v373_v58, %v373_v58 }
 0x11f   :  { %806 = vmatprep.mubr.bf16.mxu0 %v375_v62  ;;  %847 = vmatprep.mubr.bf16.mxu1 %v377_v63 }
 0x120   :  { %807 = vmatmul.mubr.bf16.vlgmr.msra.gmra.mxu0 %v374_v0  ;;  %848 = vmatmul.mubr.bf16.vlgmr.msra.gmra.mxu1 %v376_v59 }
 0x1e0   :  { %v808_v4 = vpop.f32.mrf.mxu0  ;;  %v849_v5 = vpop.f32.mrf.mxu1 }
 0x1e1   :  { %v809_v6 = vadd.f32 %v808_v4, %v447_v2 }
 0x1e2   :  { %v810_v7 = vpop.f32.mrf.mxu0  ;;  %v851_v8 = vpop.f32.mrf.mxu1 }
 0x1e3   :  { %v850_v9 = vadd.f32 %v849_v5, %v809_v6  ;;  %v811_v10 = vadd.f32 %v810_v7, %v451_v3 }
 0x1e4   :  { %v812_v11 = vpop.f32.mrf.mxu0  ;;  %v853_v12 = vpop.f32.mrf.mxu1 }
 0x1e5   :  { %v856_v13 = vmax.f32 %v850_v9, 0.0  ;;  %v852_v14 = vadd.f32 %v851_v8, %v811_v10 }
 0x1e6   :  { %v813_v15 = vpop.f32.mrf.mxu0  ;;  %v854_v16 = vpop.f32.mrf.mxu1 }
 0x1e7   :  { %858 = vst [vmem:[#allocation10] sm:$0xff] %v856_v13  ;;  %v857_v17 = vmax.f32 %v852_v14, 0.0 }
 0x1e9   :  { %859 = vst [vmem:[#allocation10 + $0x8] sm:$0xff] %v857_v17 }
 0x1ea   :  { %1218 = shalt.err (!%p1215_p10)
}
 0x1eb   :  { %869 = dma.vmem_to_hbm [thread:$0]  %s867_s16, 256, %s1298_s5, [#allocation4]  }
 0x1ec   :  { %1233 = dma.done.wait [#allocation4], 256  }
 0x1ed   :  { %1234 = vsyncadd [#allocation4], 4294967040 }
 0x1ee   :  { %873 = vsyncpa [#allocation3], 1 }
 0x1ef   :  { %874 = vsyncpa [#allocation6], 1 }
 0x1f0   :  { %875 = vsyncpa [#allocation9], 1 }
 0x1f1   :  { %876 = vsyncpa [#allocation4], 1 }

</bundles_post_ra>
